<compile_context>
chip_gen: v7x
topology: tpu7x:2x2x1
jax: 0.10.0
libtpu: 0.0.40
codegen_flags: <defaults>
</compile_context>

<pallas_src>
import functools

import jax
import jax.numpy as jnp
from jax.experimental import pallas as pl
from jax.experimental.pallas import tpu as pltpu


def _round_down(n, m):
    return (n // m) * m


def stable_layer_norm_kernel(x_ref, g_ref, b_ref, o_ref, *, eps):
    # x_ref block: (TR, D) rows; g_ref / b_ref: (1, D) f32 affine params.
    x = x_ref[...].astype(jnp.float32)                       # (TR, D)

    # Row statistics; every reduction yields a cheap (TR, 1) vector.
    amax = jnp.max(x, axis=-1, keepdims=True)                 # (TR, 1)
    mean = jnp.mean(x, axis=-1, keepdims=True)                # (TR, 1)
    xc = x - mean                                             # (TR, D)
    var = jnp.mean(xc * xc, axis=-1, keepdims=True)           # (TR, 1)

    # Fold the `x / amax` pre-normalization into the per-row scale so no
    # per-element divide (nor an extra elementwise pass) is emitted:
    #   LayerNorm(x / a) = (x - mean) * (1/a) * rsqrt(var/a^2 + eps) * g + b
    recip_a = 1.0 / amax                                      # (TR, 1) only
    inv = recip_a * jax.lax.rsqrt(var * (recip_a * recip_a) + eps)

    y = xc * inv * g_ref[...] + b_ref[...]
    o_ref[...] = y.astype(o_ref.dtype)


def stable_layer_norm(x, gamma, beta, *, eps=1e-5, block_bytes=1 << 20):
    """x: (..., D); gamma, beta: (D,). Returns same shape/dtype as x."""
    orig_shape = x.shape
    D = orig_shape[-1]
    xf = x.reshape(-1, D)
    R = xf.shape[0]
    itemsize = xf.dtype.itemsize

    # Native sublane multiple for the dtype (8 for 4B, 16 for 2B, 32 for 1B).
    sublane = max(8, 32 // itemsize)

    # Row tile sized by a VMEM-byte budget (~1 MiB input block ~= 85% of HBM
    # roofline per measured tiling data), rounded to the sublane multiple.
    tr = max(sublane, _round_down(block_bytes // (itemsize * D), sublane))
    if tr >= R:
        tr = R   # single row-block; block == full array dim is always legal
    grid = (pl.cdiv(R, tr),)   # partial tail block is masked by Pallas

    # VMEM estimate: double-buffered in + out blocks + f32 temporaries + slack.
    blk = tr * D
    vmem_est = 4 * blk * itemsize + 4 * blk * 4 + (1 << 20)
    vmem_limit = int(min(max(vmem_est, 16 << 20), 32 << 20))

    cost = pl.CostEstimate(
        flops=10 * R * D,
        transcendentals=2 * R,
        bytes_accessed=2 * R * D * itemsize + 2 * D * 4,
    )

    g32 = gamma.astype(jnp.float32).reshape(1, D)
    b32 = beta.astype(jnp.float32).reshape(1, D)

    # TODO(synk): if D is not a multiple of 128, output stores fall back to
    # masked vst.msk; a lane-padded variant would need in-kernel column masking.
    out = pl.pallas_call(
        functools.partial(stable_layer_norm_kernel, eps=eps),
        out_shape=jax.ShapeDtypeStruct((R, D), x.dtype),
        grid_spec=pltpu.PrefetchScalarGridSpec(
            num_scalar_prefetch=0,
            grid=grid,
            in_specs=[
                pl.BlockSpec((tr, D), lambda i: (i, 0)),
                pl.BlockSpec((1, D), lambda i: (0, 0)),
                pl.BlockSpec((1, D), lambda i: (0, 0)),
            ],
            out_specs=pl.BlockSpec((tr, D), lambda i: (i, 0)),
        ),
        compiler_params=pltpu.CompilerParams(
            dimension_semantics=("parallel",),
            vmem_limit_bytes=vmem_limit,
        ),
        cost_estimate=cost,
    )(xf, g32, b32)

    return out.reshape(orig_shape)


def _reference(x, gamma, beta, eps=1e-5):
    xr = x / jnp.max(x, axis=-1, keepdims=True)
    mean = jnp.mean(xr, axis=-1, keepdims=True)
    var = jnp.mean((xr - mean) ** 2, axis=-1, keepdims=True)
    return (xr - mean) * jax.lax.rsqrt(var + eps) * gamma + beta


if __name__ == "__main__":
    # Small shapes consistent with the module: (batch, seq, dim).
    B, N, D = 2, 8, 128

    key = jax.random.PRNGKey(0)
    kx, kg, kb, kx2 = jax.random.split(key, 4)

    x = jax.random.normal(kx, (B, N, D), dtype=jnp.float32)
    gamma = 1.0 + 0.1 * jax.random.normal(kg, (D,), dtype=jnp.float32)
    beta = 0.1 * jax.random.normal(kb, (D,), dtype=jnp.float32)

    out = stable_layer_norm(x, gamma, beta)
    jax.block_until_ready(out)
    assert out.shape == (B, N, D)
    ref = _reference(x, gamma, beta)
    assert jnp.allclose(out, ref, atol=1e-4, rtol=1e-4), float(
        jnp.max(jnp.abs(out - ref))
    )

    # Exercise the non-divisible (masked partial tail block) path:
    # R = 3*100 = 300 rows, small block budget -> tr = 128, grid = 3, tail = 44.
    x2 = jax.random.normal(kx2, (3, 100, D), dtype=jnp.float32)
    out2 = stable_layer_norm(x2, gamma, beta, block_bytes=64 * 1024)
    jax.block_until_ready(out2)
    ref2 = _reference(x2, gamma, beta)
    assert jnp.allclose(out2, ref2, atol=1e-4, rtol=1e-4), float(
        jnp.max(jnp.abs(out2 - ref2))
    )

    print("KERNEL_OK")
</pallas_src>

<mosaic_0001>
module attributes {stable_mosaic.version = 11 : i64} {
  func.func @stable_layer_norm_kernel(%arg0: i32, %arg1: memref<16x128xf32, #tpu.memory_space<vmem>>, %arg2: memref<1x128xf32, #tpu.memory_space<vmem>>, %arg3: memref<1x128xf32, #tpu.memory_space<vmem>>, %arg4: memref<16x128xf32, #tpu.memory_space<vmem>>) attributes {dimension_semantics = [#tpu.dimension_semantics<parallel>], iteration_bounds = array<i64: 1>, scalar_prefetch = 0 : i64, scratch_operands = 0 : i64, tpu.core_type = #tpu.core_type<tc>, window_params = [{transform_indices = @transform_0, window_bounds = array<i64: 16, 128>}, {pipeline_mode = #tpu.pipeline_mode<synchronous>, transform_indices = @transform_1, window_bounds = array<i64: 1, 128>}, {pipeline_mode = #tpu.pipeline_mode<synchronous>, transform_indices = @transform_2, window_bounds = array<i64: 1, 128>}, {transform_indices = @transform_3, window_bounds = array<i64: 16, 128>}]} {
    %c0 = arith.constant 0 : index
    %c0_0 = arith.constant 0 : index
    %0 = vector.load %arg1[%c0, %c0_0] : memref<16x128xf32, #tpu.memory_space<vmem>>, vector<16x128xf32>
    %cst = arith.constant dense<0xFF800000> : vector<16xf32>
    %1 = vector.multi_reduction <maximumf>, %0, %cst [1] : vector<16x128xf32> to vector<16xf32>
    %2 = vector.shape_cast %1 : vector<16xf32> to vector<16x1xf32>
    %cst_1 = arith.constant dense<0.000000e+00> : vector<16xf32>
    %3 = vector.multi_reduction <add>, %0, %cst_1 [1] : vector<16x128xf32> to vector<16xf32>
    %4 = vector.shape_cast %3 : vector<16xf32> to vector<16x1xf32>
    %cst_2 = arith.constant 1.280000e+02 : f32
    %5 = vector.broadcast %cst_2 : f32 to vector<16x1xf32>
    %6 = arith.divf %4, %5 : vector<16x1xf32>
    %7 = vector.broadcast %6 : vector<16x1xf32> to vector<16x128xf32>
    %8 = arith.subf %0, %7 : vector<16x128xf32>
    %9 = arith.mulf %8, %8 : vector<16x128xf32>
    %cst_3 = arith.constant dense<0.000000e+00> : vector<16xf32>
    %10 = vector.multi_reduction <add>, %9, %cst_3 [1] : vector<16x128xf32> to vector<16xf32>
    %11 = vector.shape_cast %10 : vector<16xf32> to vector<16x1xf32>
    %cst_4 = arith.constant 1.280000e+02 : f32
    %12 = vector.broadcast %cst_4 : f32 to vector<16x1xf32>
    %13 = arith.divf %11, %12 : vector<16x1xf32>
    %cst_5 = arith.constant 1.000000e+00 : f32
    %14 = vector.broadcast %cst_5 : f32 to vector<16x1xf32>
    %15 = arith.divf %14, %2 : vector<16x1xf32>
    %16 = arith.mulf %15, %15 : vector<16x1xf32>
    %17 = arith.mulf %13, %16 : vector<16x1xf32>
    %cst_6 = arith.constant 9.99999974E-6 : f32
    %18 = vector.broadcast %cst_6 : f32 to vector<16x1xf32>
    %19 = arith.addf %17, %18 : vector<16x1xf32>
    %20 = math.rsqrt %19 : vector<16x1xf32>
    %21 = arith.mulf %15, %20 : vector<16x1xf32>
    %22 = vector.broadcast %21 : vector<16x1xf32> to vector<16x128xf32>
    %23 = arith.mulf %8, %22 : vector<16x128xf32>
    %c0_7 = arith.constant 0 : index
    %c0_8 = arith.constant 0 : index
    %24 = vector.load %arg2[%c0_7, %c0_8] : memref<1x128xf32, #tpu.memory_space<vmem>>, vector<1x128xf32>
    %25 = vector.broadcast %24 : vector<1x128xf32> to vector<16x128xf32>
    %26 = arith.mulf %23, %25 : vector<16x128xf32>
    %c0_9 = arith.constant 0 : index
    %c0_10 = arith.constant 0 : index
    %27 = vector.load %arg3[%c0_9, %c0_10] : memref<1x128xf32, #tpu.memory_space<vmem>>, vector<1x128xf32>
    %28 = vector.broadcast %27 : vector<1x128xf32> to vector<16x128xf32>
    %29 = arith.addf %26, %28 : vector<16x128xf32>
    %c0_11 = arith.constant 0 : index
    %c0_12 = arith.constant 0 : index
    %30 = vector.load %arg4[%c0_11, %c0_12] : memref<16x128xf32, #tpu.memory_space<vmem>>, vector<16x128xf32>
    tpu.vector_store %arg4[%c0_11, %c0_12], %29 {strides = array<i32>} : memref<16x128xf32, #tpu.memory_space<vmem>>, vector<16x128xf32>,
    return
  }
  func.func @transform_0(%arg0: i32) -> (i32, i32) {
    %c0_i32 = arith.constant 0 : i32
    %c0_i32_0 = arith.constant 0 : i32
    return %arg0, %c0_i32 : i32, i32
  }
  func.func @transform_1(%arg0: i32) -> (i32, i32) {
    %c0_i32 = arith.constant 0 : i32
    %c0_i32_0 = arith.constant 0 : i32
    %c0_i32_1 = arith.constant 0 : i32
    return %c0_i32, %c0_i32_0 : i32, i32
  }
  func.func @transform_2(%arg0: i32) -> (i32, i32) {
    %c0_i32 = arith.constant 0 : i32
    %c0_i32_0 = arith.constant 0 : i32
    %c0_i32_1 = arith.constant 0 : i32
    return %c0_i32, %c0_i32_0 : i32, i32
  }
  func.func @transform_3(%arg0: i32) -> (i32, i32) {
    %c0_i32 = arith.constant 0 : i32
    %c0_i32_0 = arith.constant 0 : i32
    return %arg0, %c0_i32 : i32, i32
  }
}

</mosaic_0001>

<bundles_post_ra>
// kernel: tpu_custom_call.1
= control target key start
LH: loop header
LB: loop body
LE: loop exit
PB: predicated region body
PF: predicated region fallthrough
CT: control target
= control target key end

     0   :  { %8 = vsyncpa [#allocation3], 0  ;;  %s227_s0 = inlined_call_operand.hbm [shape: f32[16,128], index: 0, kind: input, shape index: {}]   ;;  %s228_s1 = inlined_call_operand.vmem [shape: f32[1,128], index: 1, kind: input, shape index: {}]   ;;  %s229_s2 = inlined_call_operand.vmem [shape: f32[1,128], index: 2, kind: input, shape index: {}]   ;;  %s230_s3 = inlined_call_operand.hbm [shape: f32[16,128], index: 3, kind: output, shape index: {}]  }
   0x1   :  { %9 = vsyncpa [#allocation4], 0  ;;  %s167_s12 = smov [#allocation2]   ;;  %s119_s16 = scalar_lea.hbm %s227_s0, 256 }
   0x2   :  { %s15_s13 = sshll.u32 %s167_s12, 4  ;;  %p120_p0 = scmp.ne.s32.totalorder %s227_s0, %s119_s16  ;;  %s16_s13 = int_to_ptr.vmem [resolvable:$true] %s15_s13 }
   0x3   :  { %p123_p1 = scmp.lt.u32.totalorder %s119_s16, %s227_s0 }
   0x5   :  { %p125_p2 = pnand %p123_p1, %p120_p0 }
   0x7   :  { %128 = shalt.err (!%p125_p2)
}
   0x8   :  { %s129_s21 = scalar_lea.vmem %s16_s13, 256  ;;  %p134_p4 = scmp.lt.s32.totalorder %s16_s13, %s16_s13 }
   0x9   :  { %p130_p3 = scmp.ne.s32.totalorder %s16_s13, %s129_s21  ;;  %p135_p5 = scmp.lt.s32.totalorder %s129_s21, %s129_s21 }
   0xb   :  { %p136_p6 = por %p135_p5, %p134_p4 }
   0xd   :  { %p137_p7 = pnand %p136_p6, %p130_p3 }
   0xf   :  { %140 = shalt.err (!%p137_p7)
}
  0x10   :  { %s168_s22 = smov 128   ;;  %s169_s23 = smov 8  }
  0x11   :  { %21 = dma.hbm_to_vmem [thread:$0]  %s227_s0, 256, %s16_s13, [#allocation3], %s168_s22, %s168_s22, %s169_s23  }
  0x12   :  { %163 = dma.done.wait [#allocation3], 256  }
  0x13   :  { %164 = vsyncadd [#allocation3], 4294967040  ;;  %v29_v0 = vld [vmem:[#allocation2] sm:$0xff]  ;;  %v30_v1 = vld [vmem:[#allocation2 + $0x8] sm:$0xff]  ;;  %s170_s29 = smov [#allocation5]  }
  0x14   :  { %35 = vadd.xlane.f32.xlu0 %v29_v0  ;;  %31 = vmax.xlane.f32.xlu1 %v29_v0  ;;  %v105_v26 = vld [vmem:[%s228_s1] ss:$0 sm:$0xff]  ;;  %s93_s30 = sshll.u32 %s170_s29, 4  ;;  %s94_s30 = int_to_ptr.vmem [resolvable:$true] %s93_s30 }
  0x15   :  { %v106_v29 = vld [vmem:[%s229_s2] ss:$0 sm:$0xff]  ;;  %s141_s4 = scalar_lea.vmem %s94_s30, 256  ;;  %p146_p9 = scmp.lt.s32.totalorder %s94_s30, %s94_s30 }
  0x16   :  { %p142_p8 = scmp.ne.s32.totalorder %s94_s30, %s141_s4  ;;  %p147_p10 = scmp.lt.s32.totalorder %s141_s4, %s141_s4 }
  0x18   :  { %37 = vadd.xlane.f32.xlu0 %v30_v1  ;;  %33 = vmax.xlane.f32.xlu1 %v30_v1  ;;  %p148_p11 = por %p147_p10, %p146_p9 }
  0x1a   :  { %p149_p12 = pnand %p148_p11, %p142_p8 }
  0xa1   :  { %v36_v2 = vpop.xlane.xlu0 %35  ;;  %v32_v10 = vpop.xlane.xlu1 %31 }
  0xa2   :  { %v40_v3 = vmul.f32 0.0078125, %v36_v2  ;;  %111 = vrcp.f32 %v32_v10 }
  0xa4   :  { %v42_v4 = vsub.f32 %v29_v0, %v40_v3 }
  0xa5   :  { %v38_v5 = vpop.xlane.xlu0 %37  ;;  %v34_v11 = vpop.xlane.xlu1 %33 }
  0xa6   :  { %v41_v6 = vmul.f32 0.0078125, %v38_v5  ;;  %v44_v7 = vmul.f32 %v42_v4, %v42_v4  ;;  %113 = vrcp.f32 %v34_v11 }
  0xa8   :  { %v43_v8 = vsub.f32 %v30_v1, %v41_v6  ;;  %46 = vadd.xlane.f32.xlu0 %v44_v7 }
  0xaa   :  { %v45_v9 = vmul.f32 %v43_v8, %v43_v8 }
  0xac   :  { %48 = vadd.xlane.f32.xlu1 %v45_v9  ;;  %v112_v12 = vpop.eup %111 }
  0xad   :  { %v56_v13 = vmul.f32 %v112_v12, %v112_v12 }
  0xb0   :  { %v114_v14 = vpop.eup %113 }
  0xb1   :  { %v57_v18 = vmul.f32 %v114_v14, %v114_v14 }
 0x135   :  { %v47_v15 = vpop.xlane.xlu0 %46 }
 0x136   :  { %v50_v16 = vmul.f32 0.0078125, %v47_v15 }
 0x138   :  { %v58_v17 = vmul.f32 %v56_v13, %v50_v16 }
 0x139   :  { %v49_v19 = vpop.xlane.xlu1 %48 }
 0x13a   :  { %v60_v20 = vadd.f32 1e-05, %v58_v17  ;;  %v51_v21 = vmul.f32 0.0078125, %v49_v19 }
 0x13c   :  { %115 = vrsqrt.f32 %v60_v20  ;;  %v59_v22 = vmul.f32 %v57_v18, %v51_v21 }
 0x13e   :  { %v61_v23 = vadd.f32 1e-05, %v59_v22 }
 0x140   :  { %117 = vrsqrt.f32 %v61_v23 }
 0x146   :  { %v116_v24 = vpop.eup %115 }
 0x147   :  { %v64_v25 = vmul.f32 %v116_v24, %v112_v12 }
 0x149   :  { %v66_v27 = vmul.f32 %v64_v25, %v42_v4 }
 0x14a   :  { %v118_v28 = vpop.eup %117 }
 0x14b   :  { %v65_v30 = vmul.f32 %v118_v28, %v114_v14  ;;  %v75_v31 = vmul.f32 %v105_v26, %v66_v27 }
 0x14d   :  { %v67_v32 = vmul.f32 %v65_v30, %v43_v8  ;;  %v84_v33 = vadd.f32 %v106_v29, %v75_v31 }
 0x14f   :  { %v76_v34 = vmul.f32 %v105_v26, %v67_v32  ;;  %86 = vst [vmem:[#allocation5] sm:$0xff] %v84_v33 }
 0x151   :  { %v85_v35 = vadd.f32 %v106_v29, %v76_v34 }
 0x153   :  { %87 = vst [vmem:[#allocation5 + $0x8] sm:$0xff] %v85_v35 }
 0x154   :  { %152 = shalt.err (!%p149_p12)
}
 0x155   :  { %s153_s5 = scalar_lea.hbm %s230_s3, 256 }
 0x156   :  { %p154_p13 = scmp.ne.s32.totalorder %s230_s3, %s153_s5  ;;  %p157_p0 = scmp.lt.u32.totalorder %s153_s5, %s230_s3 }
 0x158   :  { %p159_p1 = pnand %p157_p0, %p154_p13 }
 0x15a   :  { %162 = shalt.err (!%p159_p1)
}
 0x15b   :  { %99 = dma.vmem_to_hbm [thread:$0]  %s94_s30, 256, %s230_s3, [#allocation4], %s168_s22, %s168_s22, %s169_s23  }
 0x15c   :  { %165 = dma.done.wait [#allocation4], 256  }
 0x15d   :  { %166 = vsyncadd [#allocation4], 4294967040 }
 0x15e   :  { %103 = vsyncpa [#allocation3], 1 }
 0x15f   :  { %104 = vsyncpa [#allocation4], 1 }

</bundles_post_ra>
